<compile_context>
chip_gen: v6e
topology: v6e:2x2x1
jax: 0.10.0
libtpu: 0.0.40
codegen_flags: <defaults>
</compile_context>

<pallas_src>
import functools

import jax
import jax.numpy as jnp
from jax.experimental import pallas as pl
from jax.experimental.pallas import tpu as pltpu


# ----------------------------- Pallas kernel ------------------------------ #
def _conv1_kernel(w_ref, shift_ref, a_ref, o_ref, *, kh, stride, wo, mo):
    # w_ref:     (Cout, kh*grp)       bf16  BN-scale-folded weights (zero rows
    #                                        in each group's padding), resident
    # shift_ref: (Cout, 1)            f32   folded BatchNorm shift, resident
    # a_ref:     (1, stride, grp, U*Wo) bf16  width-im2col phases, one image
    # o_ref:     (1, Cout, Ho*Wo)     f32   flat, lane-dense output, one image
    #
    # Kernel row i = stride*a + p needs the statically shifted window
    # a_ref[0, p, :, a*Wo : a*Wo + Ho*Wo]; stitching the 7 windows along K and
    # doing a single matmul lets the MXU do the whole K=7*grp accumulation
    # without materializing per-row partial results in VMEM.
    pieces = [
        a_ref[0, i % stride, :, pl.ds((i // stride) * wo, mo)]   # (grp, mo)
        for i in range(kh)
    ]
    rhs = jnp.concatenate(pieces, axis=0)                        # (kh*grp, mo)
    acc = jnp.dot(w_ref[...], rhs, preferred_element_type=jnp.float32)
    o_ref[0] = jnp.maximum(acc + shift_ref[...], 0.0)


# ------------------------------- glue (JAX) -------------------------------- #
def _phase_width_im2col(x, kh, kw, stride, pad, grp, dtype=jnp.bfloat16):
    """x: (N, C, H, W) -> xvf: (N, stride, grp, U*Wo), plus Ho, Wo, U.

    xvf[n, p, c*kw + j, u*Wo + wx] = x_pad[n, c, stride*u + p, stride*wx + j];
    rows c*kw .. grp-1 are zero padding.  Only a ~kw/stride (3.5x) expansion
    of the input is materialized (vs. 12.25x for a full im2col), and the
    minor spatial axes are never moved off the minor positions.
    """
    n, c, h, w = x.shape
    ho = (h + 2 * pad - kh) // stride + 1
    wo = (w + 2 * pad - kw) // stride + 1
    u = ho + (kh - 1) // stride                 # row-phases needed per parity
    x = x.astype(dtype)
    xp = jnp.pad(x, ((0, 0), (0, 0), (pad, stride * u - h - pad), (pad, pad)))
    phases = []
    for p in range(stride):
        rows = xp[:, :, p::stride, :]           # (N, C, U, W + 2*pad)
        taps = [rows[:, :, :, j:j + stride * (wo - 1) + 1:stride]
                for j in range(kw)]             # each (N, C, U, Wo)
        phases.append(jnp.stack(taps, axis=2))  # (N, C, kw, U, Wo)
    xv = jnp.stack(phases, axis=1)              # (N, stride, C, kw, U, Wo)
    xvf = xv.reshape(n, stride, c * kw, u * wo)
    xvf = jnp.pad(xvf, ((0, 0), (0, 0), (0, grp - c * kw), (0, 0)))
    return xvf, ho, wo, u


def conv_bn_relu(x, weight, gamma, beta, running_mean, running_var, *,
                 stride, padding, eps=1e-3, stream_dtype=jnp.bfloat16):
    """BasicConv2d forward: relu(bn(conv2d(x, weight, bias=None))), NCHW in/out."""
    n = x.shape[0]
    cout, cin, kh, kw = weight.shape
    grp = -(-(cin * kw) // 32) * 32        # rows per phase group, tile aligned

    # Eval-mode BatchNorm folded into the weights (scale) + per-channel shift.
    # TODO(synk): train-mode BatchNorm (batch statistics) is not reproduced;
    # eval-mode running statistics are folded instead.
    scale = gamma / jnp.sqrt(running_var + eps)                    # (Cout,)
    w_scaled = weight * scale[:, None, None, None]                 # (Cout,C,kh,kw)
    wg = jnp.transpose(w_scaled, (0, 2, 1, 3)).reshape(cout, kh, cin * kw)
    wg = jnp.pad(wg, ((0, 0), (0, 0), (0, grp - cin * kw)))        # zero pad rows
    w_flat = wg.reshape(cout, kh * grp).astype(stream_dtype)
    shift = (beta - running_mean * scale).reshape(cout, 1).astype(jnp.float32)

    # Partial (width-only) im2col, streamed in bf16.
    xvf, ho, wo, u = _phase_width_im2col(x, kh, kw, stride, padding, grp,
                                         stream_dtype)
    mo = ho * wo

    kernel = functools.partial(_conv1_kernel, kh=kh, stride=stride, wo=wo, mo=mo)

    itemsize = jnp.dtype(stream_dtype).itemsize
    cost = pl.CostEstimate(
        flops=2 * n * cout * cin * kh * kw * mo,
        transcendentals=0,
        bytes_accessed=(n * stride * grp * u * wo * itemsize       # patches
                        + cout * kh * grp * itemsize               # weights
                        + cout * 4                                 # shift
                        + n * cout * mo * 4))                      # output

    out = pl.pallas_call(
        kernel,
        out_shape=jax.ShapeDtypeStruct((n, cout, mo), jnp.float32),
        grid_spec=pltpu.PrefetchScalarGridSpec(
            num_scalar_prefetch=0,
            grid=(n,),                                             # one image / step
            in_specs=[
                pl.BlockSpec((cout, kh * grp), lambda b: (0, 0)),   # resident W
                pl.BlockSpec((cout, 1), lambda b: (0, 0)),          # resident shift
                pl.BlockSpec((1, stride, grp, u * wo),              # streaming patches
                             lambda b: (b, 0, 0, 0)),
            ],
            out_specs=pl.BlockSpec((1, cout, mo), lambda b: (b, 0, 0)),
        ),
        compiler_params=pltpu.CompilerParams(
            dimension_semantics=("parallel",),
            vmem_limit_bytes=48 * 1024 * 1024),
        cost_estimate=cost,
    )(w_flat, shift, xvf)

    # (N, Cout, Ho*Wo) -> NCHW: a plain reshape, no transpose / slice needed.
    return out.reshape(n, cout, ho, wo)


class GoogLeNetPallas:
    """GoogLeNet.forward (default args: aux_logits=True, transform_input=False);
    its effective computation is conv1 = BasicConv2d(3, 64, k=7, s=2, p=3)."""

    def __init__(self, key, num_classes=1000):
        del num_classes  # fc / aux heads never execute in this forward.
        # trunc_normal_(std=0.01, a=-2, b=2): bounds are +/-200 sigma -> N(0, 0.01^2).
        self.conv1_w = jax.random.normal(key, (64, 3, 7, 7), jnp.float32) * 0.01
        # BatchNorm2d(64, eps=0.001): weight=1, bias=0 (init_weights),
        # running_mean=0, running_var=1 (PyTorch defaults).
        self.bn1_gamma = jnp.ones((64,), jnp.float32)
        self.bn1_beta = jnp.zeros((64,), jnp.float32)
        self.bn1_mean = jnp.zeros((64,), jnp.float32)
        self.bn1_var = jnp.ones((64,), jnp.float32)

    def __call__(self, x):
        # _transform_input is identity (transform_input=False);
        # _forward returns conv1(x); aux_logits=True -> forward returns x only.
        return conv_bn_relu(x, self.conv1_w, self.bn1_gamma, self.bn1_beta,
                            self.bn1_mean, self.bn1_var,
                            stride=2, padding=3, eps=1e-3)


def _reference(x, w, gamma, beta, mean, var, stride, padding, eps=1e-3,
               stream_dtype=jnp.bfloat16):
    # Same math as the kernel: BN scale folded into bf16 weights, bf16 input,
    # f32 accumulation, f32 shift + ReLU.
    scale = gamma / jnp.sqrt(var + eps)
    w_s = (w * scale[:, None, None, None]).astype(stream_dtype)
    y = jax.lax.conv_general_dilated(
        x.astype(stream_dtype), w_s, window_strides=(stride, stride),
        padding=((padding, padding), (padding, padding)),
        dimension_numbers=("NCHW", "OIHW", "NCHW"),
        preferred_element_type=jnp.float32)
    shift = (beta - mean * scale).reshape(1, -1, 1, 1)
    return jnp.maximum(y + shift, 0.0)


if __name__ == "__main__":
    key = jax.random.PRNGKey(0)
    k_w, k_x = jax.random.split(key)

    model = GoogLeNetPallas(k_w)

    # Small input consistent with the module: NCHW, 3 input channels.
    x = jax.random.normal(k_x, (2, 3, 16, 16), jnp.float32)

    out = jax.block_until_ready(model(x))
    assert out.shape == (2, 64, 8, 8), out.shape

    ref = _reference(x, model.conv1_w, model.bn1_gamma, model.bn1_beta,
                     model.bn1_mean, model.bn1_var, stride=2, padding=3)
    err = float(jnp.max(jnp.abs(out - ref)))
    assert err < 2e-3, err

    print("KERNEL_OK")
</pallas_src>

<mosaic_0001>
module attributes {stable_mosaic.version = 11 : i64} {
  func.func @_conv1_kernel(%arg0: i32, %arg1: memref<64x224xbf16, #tpu.memory_space<vmem>>, %arg2: memref<64x1xf32, #tpu.memory_space<vmem>>, %arg3: memref<1x2x32x88xbf16, #tpu.memory_space<vmem>>, %arg4: memref<1x64x64xf32, #tpu.memory_space<vmem>>) attributes {dimension_semantics = [#tpu.dimension_semantics<parallel>], iteration_bounds = array<i64: 2>, scalar_prefetch = 0 : i64, scratch_operands = 0 : i64, tpu.core_type = #tpu.core_type<tc>, window_params = [{pipeline_mode = #tpu.pipeline_mode<synchronous>, transform_indices = @transform_0, window_bounds = array<i64: 64, 224>}, {pipeline_mode = #tpu.pipeline_mode<synchronous>, transform_indices = @transform_1, window_bounds = array<i64: 64, 1>}, {transform_indices = @transform_2, window_bounds = array<i64: 1, 2, 32, 88>}, {transform_indices = @transform_3, window_bounds = array<i64: 1, 64, 64>}]} {
    %c0 = arith.constant 0 : index
    %c0_0 = arith.constant 0 : index
    %c0_1 = arith.constant 0 : index
    %c0_2 = arith.constant 0 : index
    %0 = vector.load %arg3[%c0, %c0_0, %c0_1, %c0_2] : memref<1x2x32x88xbf16, #tpu.memory_space<vmem>>, vector<1x1x32x64xbf16>
    %1 = vector.shape_cast %0 : vector<1x1x32x64xbf16> to vector<32x64xbf16>
    %c0_3 = arith.constant 0 : index
    %c1 = arith.constant 1 : index
    %c0_4 = arith.constant 0 : index
    %c0_5 = arith.constant 0 : index
    %2 = vector.load %arg3[%c0_3, %c1, %c0_4, %c0_5] : memref<1x2x32x88xbf16, #tpu.memory_space<vmem>>, vector<1x1x32x64xbf16>
    %3 = vector.shape_cast %2 : vector<1x1x32x64xbf16> to vector<32x64xbf16>
    %c0_6 = arith.constant 0 : index
    %c0_7 = arith.constant 0 : index
    %c0_8 = arith.constant 0 : index
    %c8 = arith.constant 8 : index
    %4 = vector.load %arg3[%c0_6, %c0_7, %c0_8, %c8] : memref<1x2x32x88xbf16, #tpu.memory_space<vmem>>, vector<1x1x32x64xbf16>
    %5 = vector.shape_cast %4 : vector<1x1x32x64xbf16> to vector<32x64xbf16>
    %c0_9 = arith.constant 0 : index
    %c1_10 = arith.constant 1 : index
    %c0_11 = arith.constant 0 : index
    %c8_12 = arith.constant 8 : index
    %6 = vector.load %arg3[%c0_9, %c1_10, %c0_11, %c8_12] : memref<1x2x32x88xbf16, #tpu.memory_space<vmem>>, vector<1x1x32x64xbf16>
    %7 = vector.shape_cast %6 : vector<1x1x32x64xbf16> to vector<32x64xbf16>
    %c0_13 = arith.constant 0 : index
    %c0_14 = arith.constant 0 : index
    %c0_15 = arith.constant 0 : index
    %c16 = arith.constant 16 : index
    %8 = vector.load %arg3[%c0_13, %c0_14, %c0_15, %c16] : memref<1x2x32x88xbf16, #tpu.memory_space<vmem>>, vector<1x1x32x64xbf16>
    %9 = vector.shape_cast %8 : vector<1x1x32x64xbf16> to vector<32x64xbf16>
    %c0_16 = arith.constant 0 : index
    %c1_17 = arith.constant 1 : index
    %c0_18 = arith.constant 0 : index
    %c16_19 = arith.constant 16 : index
    %10 = vector.load %arg3[%c0_16, %c1_17, %c0_18, %c16_19] : memref<1x2x32x88xbf16, #tpu.memory_space<vmem>>, vector<1x1x32x64xbf16>
    %11 = vector.shape_cast %10 : vector<1x1x32x64xbf16> to vector<32x64xbf16>
    %c0_20 = arith.constant 0 : index
    %c0_21 = arith.constant 0 : index
    %c0_22 = arith.constant 0 : index
    %c24 = arith.constant 24 : index
    %12 = vector.load %arg3[%c0_20, %c0_21, %c0_22, %c24] : memref<1x2x32x88xbf16, #tpu.memory_space<vmem>>, vector<1x1x32x64xbf16>
    %13 = vector.shape_cast %12 : vector<1x1x32x64xbf16> to vector<32x64xbf16>
    %14 = tpu.concatenate %1, %3, %5, %7, %9, %11, %13 in 0 : vector<32x64xbf16>, vector<32x64xbf16>, vector<32x64xbf16>, vector<32x64xbf16>, vector<32x64xbf16>, vector<32x64xbf16>, vector<32x64xbf16> -> vector<224x64xbf16>
    %c0_23 = arith.constant 0 : index
    %c0_24 = arith.constant 0 : index
    %15 = vector.load %arg1[%c0_23, %c0_24] : memref<64x224xbf16, #tpu.memory_space<vmem>>, vector<64x224xbf16>
    %cst = arith.constant dense<0.000000e+00> : vector<64x64xf32>
    %16 = tpu.matmul %15, %14, %cst {dimension_numbers = #tpu.dot_dimension_numbers<[1], [0], [0], [1], [0, 0, 1, 1], [], []>} : vector<64x224xbf16>, vector<224x64xbf16>, vector<64x64xf32> -> vector<64x64xf32>
    %c0_25 = arith.constant 0 : index
    %c0_26 = arith.constant 0 : index
    %17 = vector.load %arg2[%c0_25, %c0_26] : memref<64x1xf32, #tpu.memory_space<vmem>>, vector<64x1xf32>
    %18 = vector.broadcast %17 : vector<64x1xf32> to vector<64x64xf32>
    %19 = arith.addf %16, %18 : vector<64x64xf32>
    %cst_27 = arith.constant 0.000000e+00 : f32
    %20 = vector.broadcast %cst_27 : f32 to vector<64x64xf32>
    %21 = arith.maximumf %19, %20 : vector<64x64xf32>
    %c0_28 = arith.constant 0 : index
    %c0_29 = arith.constant 0 : index
    %c0_30 = arith.constant 0 : index
    %22 = vector.load %arg4[%c0_28, %c0_29, %c0_30] : memref<1x64x64xf32, #tpu.memory_space<vmem>>, vector<1x64x64xf32>
    %23 = vector.shape_cast %22 : vector<1x64x64xf32> to vector<64x64xf32>
    %24 = vector.shape_cast %21 : vector<64x64xf32> to vector<1x64x64xf32>
    tpu.vector_store %arg4[%c0_28, %c0_29, %c0_30], %24 {strides = array<i32>} : memref<1x64x64xf32, #tpu.memory_space<vmem>>, vector<1x64x64xf32>,
    return
  }
  func.func @transform_0(%arg0: i32) -> (i32, i32) {
    %c0_i32 = arith.constant 0 : i32
    %c0_i32_0 = arith.constant 0 : i32
    %c0_i32_1 = arith.constant 0 : i32
    return %c0_i32, %c0_i32_0 : i32, i32
  }
  func.func @transform_1(%arg0: i32) -> (i32, i32) {
    %c0_i32 = arith.constant 0 : i32
    %c0_i32_0 = arith.constant 0 : i32
    %c0_i32_1 = arith.constant 0 : i32
    return %c0_i32, %c0_i32_0 : i32, i32
  }
  func.func @transform_2(%arg0: i32) -> (i32, i32, i32, i32) {
    %c0_i32 = arith.constant 0 : i32
    %c0_i32_0 = arith.constant 0 : i32
    %c0_i32_1 = arith.constant 0 : i32
    %c0_i32_2 = arith.constant 0 : i32
    return %arg0, %c0_i32, %c0_i32_0, %c0_i32_1 : i32, i32, i32, i32
  }
  func.func @transform_3(%arg0: i32) -> (i32, i32, i32) {
    %c0_i32 = arith.constant 0 : i32
    %c0_i32_0 = arith.constant 0 : i32
    %c0_i32_1 = arith.constant 0 : i32
    return %arg0, %c0_i32, %c0_i32_0 : i32, i32, i32
  }
}

</mosaic_0001>

<bundles_post_ra>
// kernel: tpu_custom_call.1
= control target key start
LH: loop header
LB: loop body
LE: loop exit
PB: predicated region body
PF: predicated region fallthrough
CT: control target
= control target key end

     0   :  { %8 = vsyncpa [#allocation3], 0  ;;  %s1050_s0 = inlined_call_operand.vmem [shape: bf16[64,224], index: 0, kind: input, shape index: {}]   ;;  %s1051_s1 = inlined_call_operand.vmem [shape: f32[64,1], index: 1, kind: input, shape index: {}]   ;;  %s1052_s2 = inlined_call_operand.hbm [shape: bf16[2,2,32,88], index: 2, kind: input, shape index: {}]   ;;  %s1053_s3 = inlined_call_operand.hbm [shape: f32[2,64,64], index: 3, kind: output, shape index: {}]  }
   0x1   :  { %10 = vsyncpa [#allocation3 + $0x1], 0 }
   0x2   :  { %11 = vsyncpa [#allocation4], 0 }
   0x3   :  { %13 = vsyncpa [#allocation4 + $0x1], 0  ;;  %s787_s12 = smov 0   ;;  %s789_s13 = smov 0  }
   0x4   :  { %s791_s14 = smov 0   ;;  %s793_s15 = smov 0  }
   0x5 LB: > { %s808_s16 = sadd.s32 4294967295, %s755_s15   ;;  %s527_s17 = sadd.s32 4294967294, %s755_s15   ;;  %s755_s15 = sphi %s793_s15, %s1068_s15   ;;  %s751_s14 = sphi %s791_s14, %s1067_s14   ;;  %s747_s13 = sphi %s789_s13, %s1066_s13   ;;  %s743_s12 = sphi %s787_s12, %s1065_s12  }
   0x6   : > { %s812_s18 = sadd.s32 1, %s755_s15   ;;  %s68_s19 = sadd.s32 1, %s751_s14 }
   0x7   : > { %s65_s20 = ssub.s32 %s755_s15, %s812_s18  ;;  %p75_p0 = scmp.ne.s32.totalorder %s751_s14, %s747_s13 }
   0x8   : > { %p66_p1 = scmp.eq.s32.totalorder %s65_s20, 0  ;;  %p76_p2 = scmp.eq.s32.totalorder %s755_s15, 0 }
   0x9   : > { %p81_p3 = scmp.ne.s32.totalorder %s747_s13, %s743_s12  ;;  %p82_p4 = scmp.eq.s32.totalorder %s808_s16, 0 }
   0xa   : > { %s824_s21 = scalar_select %p66_p1, %s751_s14, %s68_s19  }
   0xb   : > { %p826_p5 = por %p76_p2, %p75_p0  ;;  %p830_p6 = por %p82_p4, %p81_p3 }
   0xc   : > { %p105_p7 = scmp.eq.s32.totalorder %s808_s16, 1  ;;  %p111_p8 = scmp.eq.s32.totalorder %s527_s17, 1 }
   0xd   : > { %s1057_s23 = scalar_select %p830_p6, 1, 0 }
   0xe   : > { %p603_p10 = scmp.lt.s32.totalorder %s755_s15, 2  ;;  %p837_p11 = por %p105_p7, %p75_p0 }
   0xf   : > { %p841_p12 = por %p111_p8, %p81_p3  ;;  %s137_s26 = sand.u32 1, %s751_s14  }
  0x10   : > { %s1058_s24 = scalar_select %p837_p11, 1, 0 }
  0x11   : > { %s1059_s25 = scalar_select %p841_p12, 1, 0 }
  0x12   : > { %s561_s27 = sshll.u32 %s755_s15, 9  ;;  %s530_s28 = sshll.u32 %s137_s26, 5 }
  0x13   : > { %s850_s4 = scalar_lea.hbm %s1052_s2, %s561_s27  ;;  %s141_s5 = scalar_lea.vmem [#allocation2], %s530_s28 }
  0x14   : > { %s148_s6 = sshll.u32 %s141_s5, 4  ;;  %p854_p13 = pnand %p603_p10, %p826_p5  ;;  %s858_s6 = int_to_ptr.vmem [resolvable:$true] %s148_s6 }
  0x15   : > { %s860_s8 = scalar_lea.sflag [#allocation3], %s137_s26  ;;  %s663_s9 = scalar_lea.hbm %s850_s4, 512 }
  0x16   : > { %p664_p0 = scmp.ne.s32.totalorder %s850_s4, %s663_s9  ;;  %p665_p1 = pneg %p854_p13 }
  0x17   : > { %s668_s17 = scalar_lea.hbm %s1052_s2, 1024  ;;  %p669_p4 = scmp.lt.s32.totalorder %s850_s4, %s1052_s2 }
  0x18   : > { %p666_p2 = pnand %p665_p1, %p664_p0  ;;  %p670_p5 = scmp.lt.s32.totalorder %s668_s17, %s663_s9 }
  0x1a   : > { %p667_p3 = pneg %p666_p2  ;;  %p671_p7 = por %p670_p5, %p669_p4 }
  0x1c   : > { %p672_p8 = pnand %p671_p7, %p667_p3 }
  0x1e   : > { %675 = shalt.err (!%p672_p8)
}
  0x1f   : > { %s676_s22 = scalar_lea.vmem %s858_s6, 512  ;;  %s757_s26 = smov [#allocation2]  }
  0x20   : > { %p677_p10 = scmp.ne.s32.totalorder %s858_s6, %s676_s22  ;;  %s681_s27 = sshll.u32 %s757_s26, 4  ;;  %s682_s27 = int_to_ptr.vmem [resolvable:$false] %s681_s27 }
  0x21   : > { %s683_s28 = scalar_lea.vmem %s682_s27, 1024  ;;  %p684_p2 = scmp.lt.s32.totalorder %s858_s6, %s682_s27 }
  0x22   : > { %p679_p9 = pnand %p677_p10, %p665_p1  ;;  %p685_p12 = scmp.lt.s32.totalorder %s683_s28, %s676_s22 }
  0x24   : > { %p680_p0 = pneg %p679_p9  ;;  %p686_p11 = por %p685_p12, %p684_p2 }
  0x26   : > { %p687_p6 = pnand %p686_p11, %p680_p0 }
  0x28   : > { %690 = shalt.err (!%p687_p6)
}
  0x29   : > { %s758_s29 = smov 64   ;;  %s759_s30 = smov 4  }
  0x2a   : > { %598 = dma.hbm_to_vmem [thread:$0]  (!%p854_p13), %s850_s4, 512, %s858_s6, %s860_s8, %s758_s29, %s758_s29, %s759_s30  }
  0x2b   : > { %p533_p9 = scmp.ge.s32.totalorder %s755_s15, 1  ;;  %p156_p1 = scmp.lt.s32.totalorder %s755_s15, 3 }
  0x2d   : > { %p157_p3 = pnand %p533_p9, %p156_p1 }
  0x2e   : > { %s884_s5 = sand.u32 (!%p157_p3), 1, %s747_s13   ;;  %p1061_p6 = scmp.ne.s32.totalorder (!%p157_p3), %s1057_s23, 0 }
  0x2f   : > { %160 = sbr.rel (%p157_p3) target bundleno = 449 (0x1c1), region = 32  ;;  %s534_s9 = sshll.u32 (!%p157_p3), %s884_s5, 5 }
  0x30   : > { %s163_s10 = scalar_lea.sflag (!%p157_p3), [#allocation3], %s884_s5  ;;  %s166_s11 = scalar_lea.vmem (!%p157_p3), [#allocation2], %s534_s9 }
  0x34   : > { %734 = dma.done.wait (%p1061_p6), %s163_s10, 512  }
  0x35   : > { %736 = vsyncadd (%p1061_p6), %s163_s10, 4294966784  ;;  %v760_v0 = vmov 0   ;;  %v647_v1 = vld [vmem:[%s166_s11 + $0x18] sm:$0xff]   ;;  %v648_v2 = vld [vmem:[%s166_s11 + $0x10] sm:$0xff]   ;;  %s761_s4 = smov 120   ;;  %s762_s23 = smov 104  }
  0x36   : > { %358 = vmatprep.subr.bf16.mxu0 %v760_v0  ;;  %563 = vmatprep.subr.bf16.mxu1 %v760_v0  ;;  %v649_v3 = vld [vmem:[%s166_s11 + $0x8] sm:$0xff]   ;;  %v896_v4 = vld [vmem:[%s166_s11] sm:$0xff]   ;;  %s763_s6 = smov 112   ;;  %vm345_vm0 = vcmask 785408   ;;  %v264_v9 = vld [vmem:[%s1051_s1 + $0x18] sm:$0xff]  ;;  %vm431_vm1 = vcmask 523264  }
  0x37   : > { %646 = vset.pattern.permute.xlu1 %v760_v0  ;;  %645 = vset.pattern.permute.xlu0 %v760_v0  ;;  %v653_v5 = vld [vmem:[%s1050_s0 + $0x4] ss:$8 sps:$4 sm:$0xff]   ;;  %v263_v10 = vld [vmem:[%s1051_s1 + $0x10] sm:$0xff]  ;;  %v268_v13 = vld [vmem:[%s1051_s1 + $0x38] sm:$0xff]  ;;  %s562_s7 = sshll.u32 %s808_s16, 10  ;;  %s441_s16 = scalar_lea.sflag [#allocation4], %s884_s5 }
  0x38   : > { %231 = vrot.lane.b32.xlu0 %v647_v1, %s761_s4  ;;  %225 = vrot.lane.b32.xlu1 %v649_v3, %s761_s4  ;;  %v656_v6 = vld [vmem:[%s1050_s0 + $0x24] ss:$8 sps:$4 sm:$0xff]   ;;  %v267_v14 = vld [vmem:[%s1051_s1 + $0x30] sm:$0xff]  ;;  %s1001_s20 = scalar_lea.hbm %s1053_s3, %s562_s7  ;;  %p1062_p12 = scmp.ne.s32.totalorder %s1058_s24, 0 }
  0x39   : > { %552 = vmatprep.mubr.msk.bf16.mxu0 %vm345_vm0, %v653_v5  ;;  %554 = vmatprep.mubr.msk.bf16.mxu1 %vm345_vm0, %v656_v6  ;;  %v261_v7 = vld [vmem:[%s1051_s1] sm:$0xff]  ;;  %v262_v8 = vld [vmem:[%s1051_s1 + $0x8] sm:$0xff]  ;;  %v657_v27 = vld [vmem:[%s1050_s0 + $0x14] ss:$8 sps:$4 sm:$0xff]   ;;  %s764_s26 = smov [#allocation5]  }
  0x3a   : > { %v266_v11 = vld [vmem:[%s1051_s1 + $0x28] sm:$0xff]  ;;  %v265_v12 = vld [vmem:[%s1051_s1 + $0x20] sm:$0xff]  ;;  %v659_v28 = vld [vmem:[%s1050_s0 + $0x34] ss:$8 sps:$4 sm:$0xff]   ;;  %s695_s27 = sshll.u32 %s764_s26, 4  ;;  %s696_s27 = int_to_ptr.vmem [resolvable:$false] %s695_s27 }
  0x3b   : > { %v651_v25 = vld [vmem:[%s1050_s0] ss:$8 sps:$4 sm:$0xff]   ;;  %v661_v29 = vld [vmem:[%s1050_s0 + $0x10] ss:$8 sps:$4 sm:$0xff]   ;;  %s697_s28 = scalar_lea.vmem %s696_s27, 2048 }
  0x3c   : > { %229 = vrot.lane.b32.xlu0 %v648_v2, %s761_s4  ;;  %223 = vrot.lane.b32.xlu1 %v896_v4, %s761_s4  ;;  %v654_v26 = vld [vmem:[%s1050_s0 + $0x20] ss:$8 sps:$4 sm:$0xff]   ;;  %v662_v30 = vld [vmem:[%s1050_s0 + $0x30] ss:$8 sps:$4 sm:$0xff]  }
  0x40   : > { %249 = vrot.lane.b32.xlu0 %v649_v3, %s762_s23  ;;  %247 = vrot.lane.b32.xlu1 %v896_v4, %s762_s23  ;;  %s535_s23 = sshll.u32 %s884_s5, 6 }
  0x44   : > { %243 = vrot.lane.b32.xlu0 %v647_v1, %s763_s6  ;;  %241 = vrot.lane.b32.xlu1 %v648_v2, %s763_s6 }
  0x48   : > { %237 = vrot.lane.b32.xlu0 %v649_v3, %s763_s6  ;;  %235 = vrot.lane.b32.xlu1 %v896_v4, %s763_s6  ;;  %s982_s6 = scalar_lea.vmem [#allocation5], %s535_s23 }
  0x49   : > { %s454_s8 = sshll.u32 %s982_s6, 4  ;;  %s1003_s8 = int_to_ptr.vmem [resolvable:$true] %s454_s8 }
  0x4a   : > { %s691_s22 = scalar_lea.vmem %s1003_s8, 1024  ;;  %p698_p5 = scmp.lt.s32.totalorder %s1003_s8, %s696_s27 }
  0x4b   : > { %p692_p11 = scmp.ne.s32.totalorder %s1003_s8, %s691_s22  ;;  %p699_p7 = scmp.lt.s32.totalorder %s697_s28, %s691_s22 }
  0x4c   : > { %271 = vperm.xlu0 %645, %v261_v7   ;;  %276 = vperm.xlu1 %646, %v262_v8  }
  0x4d   : > { %p693_p13 = pnand %p692_p11, %p1062_p12  ;;  %p700_p8 = por %p699_p7, %p698_p5 }
  0x4f   : > { %p694_p4 = pneg %p693_p13 }
  0x50   : > { %286 = vperm.xlu0 %645, %v264_v9   ;;  %281 = vperm.xlu1 %646, %v263_v10  }
  0x51   : > { %p701_p10 = pnand %p700_p8, %p694_p4 }
  0x54   : > { %296 = vperm.xlu0 %645, %v266_v11   ;;  %291 = vperm.xlu1 %646, %v265_v12  }
  0x58   : > { %306 = vperm.xlu0 %645, %v268_v13   ;;  %301 = vperm.xlu1 %646, %v267_v14  }
  0xaa   : > { %v232_v15 = vpop.permute.xlu0 %231  ;;  %v226_v17 = vpop.permute.xlu1 %225 }
  0xab   : > { %359 = vmatpush1.bf16.msra.mxu0 %v232_v15  ;;  %577 = vmatpush1.bf16.msra.mxu1 %v232_v15 }
  0xac   : > { %360 = vmatprep.subr.bf16.mxu0 %v760_v0  ;;  %564 = vmatprep.subr.bf16.mxu1 %v760_v0 }
  0xae   : > { %v230_v16 = vpop.permute.xlu0 %229  ;;  %v224_v18 = vpop.permute.xlu1 %223 }
  0xaf   : > { %361 = vmatpush1.bf16.msra.mxu0 %v230_v16  ;;  %578 = vmatpush1.bf16.msra.mxu1 %v230_v16 }
  0xb0   : > { %362 = vmatprep.subr.bf16.mxu0 %v760_v0  ;;  %565 = vmatprep.subr.bf16.mxu1 %v760_v0 }
  0xb2   : > { %v250_v19 = vpop.permute.xlu0 %249  ;;  %v248_v20 = vpop.permute.xlu1 %247 }
  0xb3   : > { %363 = vmatpush1.bf16.msra.mxu0 %v226_v17  ;;  %579 = vmatpush1.bf16.msra.mxu1 %v226_v17 }
  0xb4   : > { %364 = vmatprep.subr.bf16.mxu0 %v760_v0  ;;  %566 = vmatprep.subr.bf16.mxu1 %v760_v0 }
  0xb6   : > { %v244_v21 = vpop.permute.xlu0 %243  ;;  %v242_v22 = vpop.permute.xlu1 %241 }
  0xb7   : > { %365 = vmatpush1.bf16.msra.mxu0 %v224_v18  ;;  %580 = vmatpush1.bf16.msra.mxu1 %v224_v18 }
  0xb8   : > { %366 = vmatprep.subr.bf16.mxu0 %v760_v0  ;;  %567 = vmatprep.subr.bf16.mxu1 %v760_v0 }
  0xba   : > { %v238_v23 = vpop.permute.xlu0 %237  ;;  %v236_v24 = vpop.permute.xlu1 %235 }
  0xbb   : > { %367 = vmatpush1.bf16.msra.mxu0 %v647_v1  ;;  %581 = vmatpush1.bf16.msra.mxu1 %v647_v1 }
  0xbc   : > { %368 = vmatprep.subr.bf16.mxu0 %v760_v0  ;;  %568 = vmatprep.subr.bf16.mxu1 %v760_v0 }
  0xbf   : > { %369 = vmatpush1.bf16.msra.mxu0 %v648_v2  ;;  %582 = vmatpush1.bf16.msra.mxu1 %v648_v2 }
  0xc0   : > { %370 = vmatprep.subr.bf16.mxu0 %v760_v0  ;;  %569 = vmatprep.subr.bf16.mxu1 %v760_v0 }
  0xc3   : > { %371 = vmatpush1.bf16.msra.mxu0 %v649_v3  ;;  %583 = vmatpush1.bf16.msra.mxu1 %v649_v3 }
  0xc4   : > { %372 = vmatprep.subr.bf16.mxu0 %v760_v0  ;;  %570 = vmatprep.subr.bf16.mxu1 %v760_v0 }
  0xc7   : > { %373 = vmatpush1.bf16.msra.mxu0 %v896_v4  ;;  %584 = vmatpush1.bf16.msra.mxu1 %v896_v4  ;;  %v277_v31 = vpop.permute.xlu1 %276  ;;  %v272_v32 = vpop.permute.xlu0 %271 }
  0xc8   : > { %378 = vmatprep.subr.bf16.mxu0 %v760_v0  ;;  %571 = vmatprep.subr.bf16.mxu1 %v760_v0 }
  0xcb   : > { %379 = vmatpush2.bf16.msra.mxu0 %v250_v19  ;;  %585 = vmatpush2.bf16.msra.mxu1 %v250_v19  ;;  %v282_v33 = vpop.permute.xlu1 %281  ;;  %v287_v34 = vpop.permute.xlu0 %286 }
  0xcc   : > { %380 = vmatprep.subr.bf16.mxu0 %v760_v0  ;;  %572 = vmatprep.subr.bf16.mxu1 %v760_v0 }
  0xcf   : > { %381 = vmatpush2.bf16.msra.mxu0 %v248_v20  ;;  %586 = vmatpush2.bf16.msra.mxu1 %v248_v20  ;;  %v292_v35 = vpop.permute.xlu1 %291  ;;  %v297_v42 = vpop.permute.xlu0 %296 }
  0xd0   : > { %382 = vmatprep.subr.bf16.mxu0 %v760_v0  ;;  %573 = vmatprep.subr.bf16.mxu1 %v760_v0 }
  0xd3   : > { %383 = vmatpush2.bf16.msra.mxu0 %v244_v21  ;;  %587 = vmatpush2.bf16.msra.mxu1 %v244_v21  ;;  %v302_v51 = vpop.permute.xlu1 %301  ;;  %v307_v60 = vpop.permute.xlu0 %306 }
  0xd4   : > { %384 = vmatprep.subr.bf16.mxu0 %v760_v0  ;;  %574 = vmatprep.subr.bf16.mxu1 %v760_v0 }
  0xd7   : > { %385 = vmatpush2.bf16.msra.mxu0 %v242_v22  ;;  %588 = vmatpush2.bf16.msra.mxu1 %v242_v22 }
  0xd8   : > { %386 = vmatprep.subr.bf16.mxu0 %v760_v0  ;;  %575 = vmatprep.subr.bf16.mxu1 %v760_v0 }
  0xdb   : > { %387 = vmatpush2.bf16.msra.mxu0 %v238_v23  ;;  %589 = vmatpush2.bf16.msra.mxu1 %v238_v23 }
  0xdc   : > { %388 = vmatprep.subr.bf16.mxu0 %v760_v0  ;;  %576 = vmatprep.subr.bf16.mxu1 %v760_v0 }
  0xdf   : > { %389 = vmatpush2.bf16.msra.mxu0 %v236_v24  ;;  %590 = vmatpush2.bf16.msra.mxu1 %v236_v24 }
  0xe2   : > { %391 = vmatmul.mubr.bf16.vlgmr.msra.gmra.mxu0 %v651_v25  ;;  %407 = vmatmul.mubr.bf16.vlgmr.msra.gmra.mxu1 %v654_v26 }
  0xe3   : > { %553 = vmatprep.mubr.msk.bf16.mxu0 %vm345_vm0, %v657_v27  ;;  %555 = vmatprep.mubr.msk.bf16.mxu1 %vm345_vm0, %v659_v28 }
  0xea   : > { %399 = vmatmul.mubr.bf16.gmra.mxu0 %v661_v29  ;;  %415 = vmatmul.mubr.bf16.gmra.mxu1 %v662_v30 }
 0x1a2   : > { %v392_v36 = vpop.f32.mrf.mxu0  ;;  %v408_v37 = vpop.f32.mrf.mxu1 }
 0x1a3   : > { %v393_v38 = vadd.f32 %v392_v36, %v272_v32  ;;  %v409_v39 = vadd.f32 %v408_v37, %v292_v35 }
 0x1a4   : > { %v394_v40 = vpop.f32.mrf.mxu0  ;;  %v410_v41 = vpop.f32.mrf.mxu1 }
 0x1a5   : > { %v423_v43 = vmax.f32 %v393_v38, 0.0  ;;  %v427_v44 = vmax.f32 %v409_v39, 0.0 }
 0x1a6   : > { %v395_v45 = vpop.f32.mrf.mxu0  ;;  %v411_v46 = vpop.f32.mrf.mxu1 }
 0x1a7   : > { %432 = vst.msk [vmem:[%s982_s6] sm:$0xff] %vm431_vm1, %v423_v43  ;;  %436 = vst.msk [vmem:[%s982_s6 + $0x20] sm:$0xff] %vm431_vm1, %v427_v44  ;;  %v396_v47 = vadd.f32 %v395_v45, %v277_v31  ;;  %v412_v48 = vadd.f32 %v411_v46, %v297_v42 }
 0x1a8   : > { %v397_v49 = vpop.f32.mrf.mxu0  ;;  %v413_v50 = vpop.f32.mrf.mxu1 }
 0x1a9   : > { %v424_v52 = vmax.f32 %v396_v47, 0.0  ;;  %v428_v53 = vmax.f32 %v412_v48, 0.0 }
 0x1aa   : > { %v400_v54 = vpop.f32.mrf.mxu0  ;;  %v416_v55 = vpop.f32.mrf.mxu1 }
 0x1ab   : > { %433 = vst.msk [vmem:[%s982_s6 + $0x8] sm:$0xff] %vm431_vm1, %v424_v52  ;;  %437 = vst.msk [vmem:[%s982_s6 + $0x28] sm:$0xff] %vm431_vm1, %v428_v53  ;;  %v401_v56 = vadd.f32 %v400_v54, %v282_v33  ;;  %v417_v57 = vadd.f32 %v416_v55, %v302_v51 }
 0x1ac   : > { %v402_v58 = vpop.f32.mrf.mxu0  ;;  %v418_v59 = vpop.f32.mrf.mxu1 }
 0x1ad   : > { %v425_v61 = vmax.f32 %v401_v56, 0.0  ;;  %v429_v62 = vmax.f32 %v417_v57, 0.0 }
 0x1ae   : > { %v403_v63 = vpop.f32.mrf.mxu0  ;;  %v419_v0 = vpop.f32.mrf.mxu1 }
 0x1af   : > { %434 = vst.msk [vmem:[%s982_s6 + $0x10] sm:$0xff] %vm431_vm1, %v425_v61  ;;  %438 = vst.msk [vmem:[%s982_s6 + $0x30] sm:$0xff] %vm431_vm1, %v429_v62  ;;  %v404_v1 = vadd.f32 %v403_v63, %v287_v34  ;;  %v420_v2 = vadd.f32 %v419_v0, %v307_v60 }
 0x1b0   : > { %v405_v3 = vpop.f32.mrf.mxu0  ;;  %v421_v4 = vpop.f32.mrf.mxu1 }
 0x1b1   : > { %v426_v5 = vmax.f32 %v404_v1, 0.0  ;;  %v430_v6 = vmax.f32 %v420_v2, 0.0 }
 0x1b3   : > { %435 = vst.msk [vmem:[%s982_s6 + $0x18] sm:$0xff] %vm431_vm1, %v426_v5  ;;  %439 = vst.msk [vmem:[%s982_s6 + $0x38] sm:$0xff] %vm431_vm1, %v430_v6 }
 0x1b4   : > { %704 = shalt.err (!%p701_p10)
}
 0x1b5   : > { %s705_s29 = scalar_lea.hbm %s1001_s20, 1024  ;;  %s709_s10 = scalar_lea.hbm %s1053_s3, 2048 }
 0x1b6   : > { %p706_p0 = scmp.ne.s32.totalorder %s1001_s20, %s705_s29  ;;  %p710_p1 = scmp.lt.s32.totalorder %s1001_s20, %s1053_s3 }
 0x1b7   : > { %p711_p3 = scmp.lt.s32.totalorder %s709_s10, %s705_s29 }
 0x1b8   : > { %p707_p2 = pnand %p706_p0, %p1062_p12 }
 0x1b9   : > { %p712_p6 = por %p711_p3, %p710_p1 }
 0x1ba   : > { %p708_p9 = pneg %p707_p2 }
 0x1bc   : > { %p713_p11 = pnand %p712_p6, %p708_p9 }
 0x1be   : > { %716 = shalt.err (!%p713_p11)
}
 0x1bf   : > { %s765_s23 = smov 128   ;;  %s766_s6 = smov 8  }
 0x1c0   : > { %593 = dma.vmem_to_hbm [thread:$0]  (%p1062_p12), %s1003_s8, 1024, %s1001_s20, %s441_s16, %s765_s23, %s765_s23, %s766_s6  }
 0x1c1 PF: > { %s469_s7 = sand.u32 1, %s743_s12   ;;  %p1063_p13 = scmp.ne.s32.totalorder %s1059_s25, 0 }
 0x1c2   : > { %p1064_p4 = scmp.ge.s32.totalorder %s755_s15, 2  ;;  %s470_s17 = scalar_lea.sflag [#allocation4], %s469_s7 }
 0x1c4   : > { %p600_p5 = pnand %p1064_p4, %p1063_p13 }
 0x1c6   : > { %p601_p7 = pneg %p600_p5 }
 0x1c8   : > { %738 = dma.done.wait (%p601_p7), %s470_s17, 1024  }
 0x1c9   : > { %740 = vsyncadd (%p601_p7), %s470_s17, 4294966272  ;;  %p16_p8 = scmp.ge.s32.totalorder %s812_s18, 4   ;;  %s1065_s12 = smov %s747_s13 }
 0x1ca   : > { %s1066_s13 = smov %s751_s14  ;;  %s1067_s14 = smov %s824_s21 }
 0x1cb   : > { %s1068_s15 = smov %s812_s18  ;;  %18 = sbr.rel (!%p16_p8) target bundleno = 5 (0x5), region = 78 }
 0x1d0   :  { %475 = vsyncpa [#allocation3], 1 }
 0x1d1   :  { %477 = vsyncpa [#allocation3 + $0x1], 1 }
 0x1d2   :  { %478 = vsyncpa [#allocation4], 1 }
 0x1d3   :  { %480 = vsyncpa [#allocation4 + $0x1], 1 }

</bundles_post_ra>
